<compile_context>
chip_gen: v7x
topology: tpu7x:2x2x1
jax: 0.10.0
libtpu: 0.0.40
codegen_flags: <defaults>
</compile_context>

<pallas_src>
import jax
import jax.numpy as jnp
from jax.experimental import pallas as pl
from jax.experimental.pallas import tpu as pltpu


TB_MAX = 2048  # batch-tile rows: ~1.8 MiB/x-buffer at HW=225 f32 (>=85% HBM roofline)


def _stable_softplus(x):
    # numerically stable softplus (matches torch.nn.functional.softplus)
    return jnp.maximum(x, 0.0) + jnp.log1p(jnp.exp(-jnp.abs(x)))


def _round_up(n, m):
    return ((n + m - 1) // m) * m


def make_ana_kernel(height, sensor_size, positive_eng, positive_pos,
                    normalize_position):
    cell_size = sensor_size / height
    center = sensor_size / 2.0
    half_cell = cell_size / 2.0

    def kernel(params_ref, x_ref, m_ref, out_ref):
        # x_ref: (TB, HW) VMEM tile, m_ref: (HW, 128) VMEM (resident),
        # params_ref: (8,) SMEM, out_ref: (TB, 3) VMEM.
        # One MXU matmul performs all three lane reductions at once:
        #   col 0 = sum(x), col 1 = sum(x * pos_x), col 2 = sum(x * pos_y)
        r = jnp.dot(x_ref[...], m_ref[...],
                    preferred_element_type=jnp.float32,
                    precision=jax.lax.Precision.HIGHEST)        # (TB, 128)
        total = r[:, 0:1]                                       # (TB, 1)
        wx = r[:, 1:2]
        wy = r[:, 2:3]

        # fc1: Linear(1, 1) on the total energy
        w1 = params_ref[0]
        b1 = params_ref[1]
        eng = total * w1 + b1                                   # (TB, 1)

        # center-of-mass position (no zero-guard, matching torch reference)
        inv_total = 1.0 / total
        posx = wx * inv_total - center
        posy = wy * inv_total - center
        if normalize_position:
            if height % 2 == 0:
                posx = posx / cell_size
                posy = posy / cell_size
            else:
                posx = (posx + half_cell) / cell_size
                posy = (posy + half_cell) / cell_size

        # fc2: Linear(2, 2) -> explicit scalar FMAs
        w2_00 = params_ref[2]
        w2_01 = params_ref[3]
        w2_10 = params_ref[4]
        w2_11 = params_ref[5]
        b2_0 = params_ref[6]
        b2_1 = params_ref[7]
        o1 = posx * w2_00 + posy * w2_01 + b2_0                 # (TB, 1)
        o2 = posx * w2_10 + posy * w2_11 + b2_1                 # (TB, 1)

        if positive_eng:
            eng = _stable_softplus(eng)
        if positive_pos:
            o1 = _stable_softplus(o1)
            o2 = _stable_softplus(o2)

        # write columns directly (no concatenate / no lane padding)
        out_ref[:, 0:1] = eng
        out_ref[:, 1:2] = o1
        out_ref[:, 2:3] = o2

    return kernel


def ana_model_forward(x, params, *, height=15, width=15, sensor_size=60.6,
                      positive_eng=True, positive_pos=False,
                      normalize_position=True):
    """x: (B, H, W) float32. params: dict with fc1/fc2 weights and biases."""
    B = x.shape[0]
    HW = height * width
    x_flat = x.reshape(B, HW).astype(jnp.float32)

    # pick batch tile and zero-pad B to a multiple of it (padded rows are
    # discarded below; their 0/0 garbage is never returned)
    tb = min(TB_MAX, _round_up(B, 8))
    padded_B = _round_up(B, tb)
    if padded_B != B:
        x_flat = jnp.pad(x_flat, ((0, padded_B - B), (0, 0)))

    # constant reduction matrix: columns [ones, pos_x, pos_y], rest zero
    cell_size = sensor_size / height
    idx = jnp.arange(HW, dtype=jnp.float32)
    px = (idx // width) * cell_size + cell_size / 2.0   # row coordinate (i)
    py = (idx % width) * cell_size + cell_size / 2.0    # col coordinate (j)
    red = jnp.zeros((HW, 128), jnp.float32)
    red = red.at[:, 0].set(1.0).at[:, 1].set(px).at[:, 2].set(py)

    # pack fc1 (1x1 weight, 1 bias) and fc2 (2x2 weight, 2 bias) into SMEM
    packed = jnp.concatenate([
        params["fc1_w"].reshape(-1),   # w1
        params["fc1_b"].reshape(-1),   # b1
        params["fc2_w"].reshape(-1),   # w2_00 w2_01 w2_10 w2_11
        params["fc2_b"].reshape(-1),   # b2_0 b2_1
    ]).astype(jnp.float32)             # (8,)

    kernel = make_ana_kernel(height, sensor_size, positive_eng,
                             positive_pos, normalize_position)

    out = pl.pallas_call(
        kernel,
        out_shape=jax.ShapeDtypeStruct((padded_B, 3), jnp.float32),
        grid_spec=pltpu.PrefetchScalarGridSpec(
            num_scalar_prefetch=0,
            grid=(padded_B // tb,),
            in_specs=[
                pl.BlockSpec(memory_space=pltpu.SMEM),        # packed params (8,)
                pl.BlockSpec((tb, HW), lambda i: (i, 0)),     # x tile
                pl.BlockSpec((HW, 128), lambda i: (0, 0)),    # reduction matrix (resident)
            ],
            out_specs=pl.BlockSpec((tb, 3), lambda i: (i, 0)),
        ),
        compiler_params=pltpu.CompilerParams(
            dimension_semantics=("parallel",),      # megacore sharding on v7x
            vmem_limit_bytes=32 * 1024 * 1024,      # headroom for tiles + temps
        ),
    )(packed, x_flat, red)

    return out[:B]


def ana_model_reference(x, params, *, height=15, width=15, sensor_size=60.6,
                        positive_eng=True, positive_pos=False,
                        normalize_position=True):
    """Plain-JAX reference mirroring the PyTorch forward."""
    B = x.shape[0]
    cell_size = sensor_size / height
    x_flat = x.reshape(B, height * width)
    eng = x_flat.sum(axis=1, keepdims=True) * params["fc1_w"].reshape(()) \
        + params["fc1_b"].reshape(())
    total = x.sum(axis=(1, 2))
    ii = jnp.arange(height, dtype=jnp.float32)
    jj = jnp.arange(width, dtype=jnp.float32)
    cx = (ii[:, None] * cell_size + cell_size / 2.0) * jnp.ones((1, width))
    cy = jnp.ones((height, 1)) * (jj[None, :] * cell_size + cell_size / 2.0)
    cell_pos = jnp.stack([cx, cy], axis=-1)                    # (H, W, 2)
    weighted = x[..., None] * cell_pos[None]                   # (B, H, W, 2)
    pos = weighted.sum(axis=(1, 2)) / total[:, None]
    pos = pos - jnp.array([sensor_size / 2.0, sensor_size / 2.0])
    if normalize_position:
        if height % 2 == 0:
            pos = pos / cell_size
        else:
            pos = (pos + cell_size / 2.0) / cell_size
    pos = pos @ params["fc2_w"].T + params["fc2_b"]
    res = jnp.concatenate([eng, pos], axis=1)
    if positive_eng:
        res = res.at[:, 0].set(jax.nn.softplus(res[:, 0]))
    if positive_pos:
        res = res.at[:, 1:].set(jax.nn.softplus(res[:, 1:]))
    return res


if __name__ == "__main__":
    key = jax.random.PRNGKey(0)
    k_x, k_w1, k_b1, k_w2, k_b2 = jax.random.split(key, 5)

    B, H, W = 2, 15, 15
    # positive "energy deposits" so total_eng != 0
    x = jax.random.uniform(k_x, (B, H, W), dtype=jnp.float32) + 0.1

    params = {
        "fc1_w": jax.random.normal(k_w1, (1, 1), dtype=jnp.float32) * 0.1,
        "fc1_b": jax.random.normal(k_b1, (1,), dtype=jnp.float32) * 0.1,
        "fc2_w": jax.random.normal(k_w2, (2, 2), dtype=jnp.float32) * 0.1,
        "fc2_b": jax.random.normal(k_b2, (2,), dtype=jnp.float32) * 0.1,
    }

    out = ana_model_forward(x, params)
    out = jax.block_until_ready(out)

    ref = ana_model_reference(x, params)
    assert out.shape == (B, 3), out.shape
    assert jnp.allclose(out, ref, atol=1e-4, rtol=1e-4), (out, ref)

    print("KERNEL_OK")
</pallas_src>

<mosaic_0001>
module attributes {stable_mosaic.version = 11 : i64} {
  func.func @kernel(%arg0: i32, %arg1: memref<8xf32, #tpu.memory_space<smem>>, %arg2: memref<8x225xf32, #tpu.memory_space<vmem>>, %arg3: memref<225x128xf32, #tpu.memory_space<vmem>>, %arg4: memref<8x3xf32, #tpu.memory_space<vmem>>) attributes {dimension_semantics = [#tpu.dimension_semantics<parallel>], iteration_bounds = array<i64: 1>, scalar_prefetch = 0 : i64, scratch_operands = 0 : i64, tpu.core_type = #tpu.core_type<tc>, window_params = [{transform_indices = @transform_0, window_bounds = array<i64: 8>}, {transform_indices = @transform_1, window_bounds = array<i64: 8, 225>}, {pipeline_mode = #tpu.pipeline_mode<synchronous>, transform_indices = @transform_2, window_bounds = array<i64: 225, 128>}, {transform_indices = @transform_3, window_bounds = array<i64: 8, 3>}]} {
    %c0 = arith.constant 0 : index
    %c0_0 = arith.constant 0 : index
    %0 = vector.load %arg2[%c0, %c0_0] : memref<8x225xf32, #tpu.memory_space<vmem>>, vector<8x225xf32>
    %c0_1 = arith.constant 0 : index
    %c0_2 = arith.constant 0 : index
    %1 = vector.load %arg3[%c0_1, %c0_2] : memref<225x128xf32, #tpu.memory_space<vmem>>, vector<225x128xf32>
    %cst = arith.constant dense<0.000000e+00> : vector<8x128xf32>
    %2 = tpu.matmul %0, %1, %cst {dimension_numbers = #tpu.dot_dimension_numbers<[1], [0], [0], [1], [0, 0, 1, 1], [], []>, precision = #tpu.contract_precision<fp32>} : vector<8x225xf32>, vector<225x128xf32>, vector<8x128xf32> -> vector<8x128xf32>
    %3 = vector.extract_strided_slice %2 {offsets = [0, 0], sizes = [8, 1], strides = [1, 1]} : vector<8x128xf32> to vector<8x1xf32>
    %4 = vector.extract_strided_slice %2 {offsets = [0, 1], sizes = [8, 1], strides = [1, 1]} : vector<8x128xf32> to vector<8x1xf32>
    %5 = vector.extract_strided_slice %2 {offsets = [0, 2], sizes = [8, 1], strides = [1, 1]} : vector<8x128xf32> to vector<8x1xf32>
    %c0_3 = arith.constant 0 : index
    %6 = memref.load %arg1[%c0_3] : memref<8xf32, #tpu.memory_space<smem>>
    %c1 = arith.constant 1 : index
    %7 = memref.load %arg1[%c1] : memref<8xf32, #tpu.memory_space<smem>>
    %8 = vector.broadcast %6 : f32 to vector<8x1xf32>
    %9 = arith.mulf %3, %8 : vector<8x1xf32>
    %10 = vector.broadcast %7 : f32 to vector<8x1xf32>
    %11 = arith.addf %9, %10 : vector<8x1xf32>
    %cst_4 = arith.constant 1.000000e+00 : f32
    %12 = vector.broadcast %cst_4 : f32 to vector<8x1xf32>
    %13 = arith.divf %12, %3 : vector<8x1xf32>
    %14 = arith.mulf %4, %13 : vector<8x1xf32>
    %cst_5 = arith.constant 3.030000e+01 : f32
    %15 = vector.broadcast %cst_5 : f32 to vector<8x1xf32>
    %16 = arith.subf %14, %15 : vector<8x1xf32>
    %17 = arith.mulf %5, %13 : vector<8x1xf32>
    %cst_6 = arith.constant 3.030000e+01 : f32
    %18 = vector.broadcast %cst_6 : f32 to vector<8x1xf32>
    %19 = arith.subf %17, %18 : vector<8x1xf32>
    %cst_7 = arith.constant 2.020000e+00 : f32
    %20 = vector.broadcast %cst_7 : f32 to vector<8x1xf32>
    %21 = arith.addf %16, %20 : vector<8x1xf32>
    %cst_8 = arith.constant 4.040000e+00 : f32
    %22 = vector.broadcast %cst_8 : f32 to vector<8x1xf32>
    %23 = arith.divf %21, %22 : vector<8x1xf32>
    %cst_9 = arith.constant 2.020000e+00 : f32
    %24 = vector.broadcast %cst_9 : f32 to vector<8x1xf32>
    %25 = arith.addf %19, %24 : vector<8x1xf32>
    %cst_10 = arith.constant 4.040000e+00 : f32
    %26 = vector.broadcast %cst_10 : f32 to vector<8x1xf32>
    %27 = arith.divf %25, %26 : vector<8x1xf32>
    %c2 = arith.constant 2 : index
    %28 = memref.load %arg1[%c2] : memref<8xf32, #tpu.memory_space<smem>>
    %c3 = arith.constant 3 : index
    %29 = memref.load %arg1[%c3] : memref<8xf32, #tpu.memory_space<smem>>
    %c4 = arith.constant 4 : index
    %30 = memref.load %arg1[%c4] : memref<8xf32, #tpu.memory_space<smem>>
    %c5 = arith.constant 5 : index
    %31 = memref.load %arg1[%c5] : memref<8xf32, #tpu.memory_space<smem>>
    %c6 = arith.constant 6 : index
    %32 = memref.load %arg1[%c6] : memref<8xf32, #tpu.memory_space<smem>>
    %c7 = arith.constant 7 : index
    %33 = memref.load %arg1[%c7] : memref<8xf32, #tpu.memory_space<smem>>
    %34 = vector.broadcast %28 : f32 to vector<8x1xf32>
    %35 = arith.mulf %23, %34 : vector<8x1xf32>
    %36 = vector.broadcast %29 : f32 to vector<8x1xf32>
    %37 = arith.mulf %27, %36 : vector<8x1xf32>
    %38 = arith.addf %35, %37 : vector<8x1xf32>
    %39 = vector.broadcast %32 : f32 to vector<8x1xf32>
    %40 = arith.addf %38, %39 : vector<8x1xf32>
    %41 = vector.broadcast %30 : f32 to vector<8x1xf32>
    %42 = arith.mulf %23, %41 : vector<8x1xf32>
    %43 = vector.broadcast %31 : f32 to vector<8x1xf32>
    %44 = arith.mulf %27, %43 : vector<8x1xf32>
    %45 = arith.addf %42, %44 : vector<8x1xf32>
    %46 = vector.broadcast %33 : f32 to vector<8x1xf32>
    %47 = arith.addf %45, %46 : vector<8x1xf32>
    %cst_11 = arith.constant 0.000000e+00 : f32
    %48 = vector.broadcast %cst_11 : f32 to vector<8x1xf32>
    %49 = arith.maximumf %11, %48 : vector<8x1xf32>
    %50 = math.absf %11 : vector<8x1xf32>
    %cst_12 = arith.constant 0.000000e+00 : f32
    %51 = vector.broadcast %cst_12 : f32 to vector<8x1xf32>
    %52 = arith.subf %51, %50 : vector<8x1xf32>
    %53 = math.exp %52 : vector<8x1xf32>
    %54 = math.log1p %53 : vector<8x1xf32>
    %55 = arith.addf %49, %54 : vector<8x1xf32>
    %c0_13 = arith.constant 0 : index
    %c0_14 = arith.constant 0 : index
    %56 = vector.load %arg4[%c0_13, %c0_14] : memref<8x3xf32, #tpu.memory_space<vmem>>, vector<8x1xf32>
    tpu.vector_store %arg4[%c0_13, %c0_14], %55 {strides = array<i32>} : memref<8x3xf32, #tpu.memory_space<vmem>>, vector<8x1xf32>,
    %c0_15 = arith.constant 0 : index
    %c1_16 = arith.constant 1 : index
    %57 = vector.load %arg4[%c0_15, %c1_16] : memref<8x3xf32, #tpu.memory_space<vmem>>, vector<8x1xf32>
    tpu.vector_store %arg4[%c0_15, %c1_16], %40 {strides = array<i32>} : memref<8x3xf32, #tpu.memory_space<vmem>>, vector<8x1xf32>,
    %c0_17 = arith.constant 0 : index
    %c2_18 = arith.constant 2 : index
    %58 = vector.load %arg4[%c0_17, %c2_18] : memref<8x3xf32, #tpu.memory_space<vmem>>, vector<8x1xf32>
    tpu.vector_store %arg4[%c0_17, %c2_18], %47 {strides = array<i32>} : memref<8x3xf32, #tpu.memory_space<vmem>>, vector<8x1xf32>,
    return
  }
  func.func @transform_0(%arg0: i32) -> i32 {
    %c0_i32 = arith.constant 0 : i32
    %c0_i32_0 = arith.constant 0 : i32
    return %c0_i32 : i32
  }
  func.func @transform_1(%arg0: i32) -> (i32, i32) {
    %c0_i32 = arith.constant 0 : i32
    %c0_i32_0 = arith.constant 0 : i32
    return %arg0, %c0_i32 : i32, i32
  }
  func.func @transform_2(%arg0: i32) -> (i32, i32) {
    %c0_i32 = arith.constant 0 : i32
    %c0_i32_0 = arith.constant 0 : i32
    %c0_i32_1 = arith.constant 0 : i32
    return %c0_i32, %c0_i32_0 : i32, i32
  }
  func.func @transform_3(%arg0: i32) -> (i32, i32) {
    %c0_i32 = arith.constant 0 : i32
    %c0_i32_0 = arith.constant 0 : i32
    return %arg0, %c0_i32 : i32, i32
  }
}

</mosaic_0001>

<bundles_post_ra>
// kernel: tpu_custom_call.1
= control target key start
LH: loop header
LB: loop body
LE: loop exit
PB: predicated region body
PF: predicated region fallthrough
CT: control target
= control target key end

     0   :  { %8 = vsyncpa [#allocation4], 0  ;;  %s1936_s0 = inlined_call_operand.hbm [shape: f32[8], index: 0, kind: input, shape index: {}]   ;;  %s1937_s1 = inlined_call_operand.hbm [shape: f32[8,225], index: 1, kind: input, shape index: {}]   ;;  %s1938_s2 = inlined_call_operand.hbm [shape: f32[225,128], index: 2, kind: input, shape index: {}]   ;;  %s1939_s3 = inlined_call_operand.vmem [shape: f32[8,3], index: 3, kind: output, shape index: {}]  }
   0x1   :  { %9 = vsyncpa [#allocation3], 0 }
   0x2   :  { %10 = vsyncpa [#allocation7], 0  ;;  %s1283_s14 = scalar_lea.hbm %s1936_s0, 16 }
   0x3   :  { %p1284_p0 = scmp.ne.s32.totalorder %s1936_s0, %s1283_s14  ;;  %p1287_p1 = scmp.lt.u32.totalorder %s1283_s14, %s1936_s0 }
   0x5   :  { %p1289_p2 = pnand %p1287_p1, %p1284_p0 }
   0x7   :  { %1292 = shalt.err (!%p1289_p2)
}
   0x8   :  { %s1343_s19 = smov [#allocation2]   ;;  %s1344_s22 = smov [#allocation5]  }
   0x9   :  { %18 = dma.hbm_to_smem %s1936_s0, 16, %s1343_s19, [#allocation4]  }
   0xa   :  { %s25_s23 = sshll.u32 %s1344_s22, 4  ;;  %s1345_s24 = smov [#allocation6]   ;;  %s26_s23 = int_to_ptr.vmem [resolvable:$true] %s25_s23 }
   0xb   :  { %s34_s25 = sshll.u32 %s1345_s24, 4  ;;  %s1293_s28 = scalar_lea.hbm %s1937_s1, 256  ;;  %s35_s25 = int_to_ptr.vmem [resolvable:$true] %s34_s25 }
   0xc   :  { %p1294_p3 = scmp.ne.s32.totalorder %s1937_s1, %s1293_s28  ;;  %p1297_p4 = scmp.lt.u32.totalorder %s1293_s28, %s1937_s1 }
   0xe   :  { %p1299_p5 = pnand %p1297_p4, %p1294_p3 }
  0x10   :  { %1302 = shalt.err (!%p1299_p5)
}
  0x11   :  { %s1303_s0 = scalar_lea.vmem %s26_s23, 256  ;;  %p1308_p7 = scmp.lt.s32.totalorder %s26_s23, %s26_s23 }
  0x12   :  { %p1304_p6 = scmp.ne.s32.totalorder %s26_s23, %s1303_s0  ;;  %p1309_p8 = scmp.lt.s32.totalorder %s1303_s0, %s1303_s0 }
  0x14   :  { %p1310_p9 = por %p1309_p8, %p1308_p7 }
  0x16   :  { %p1311_p10 = pnand %p1310_p9, %p1304_p6 }
  0x18   :  { %1314 = shalt.err (!%p1311_p10)
}
  0x19   :  { %28 = dma.hbm_to_vmem [thread:$0]  %s1937_s1, 256, %s26_s23, [#allocation3]  }
  0x1a   :  { %s1315_s10 = scalar_lea.hbm %s1938_s2, 3712 }
  0x1b   :  { %p1316_p11 = scmp.ne.s32.totalorder %s1938_s2, %s1315_s10  ;;  %p1319_p12 = scmp.lt.u32.totalorder %s1315_s10, %s1938_s2 }
  0x1d   :  { %p1321_p13 = pnand %p1319_p12, %p1316_p11 }
  0x1f   :  { %1324 = shalt.err (!%p1321_p13)
}
  0x20   :  { %s1325_s15 = scalar_lea.vmem %s35_s25, 3712  ;;  %p1330_p1 = scmp.lt.s32.totalorder %s35_s25, %s35_s25 }
  0x21   :  { %p1326_p0 = scmp.ne.s32.totalorder %s35_s25, %s1325_s15  ;;  %p1331_p2 = scmp.lt.s32.totalorder %s1325_s15, %s1325_s15 }
  0x23   :  { %p1332_p3 = por %p1331_p2, %p1330_p1 }
  0x25   :  { %p1333_p4 = pnand %p1332_p3, %p1326_p0 }
  0x27   :  { %1336 = shalt.err (!%p1333_p4)
}
  0x28   :  { %s1346_s1 = smov 128   ;;  %s1347_s16 = smov 8  }
  0x29   :  { %40 = dma.hbm_to_vmem [thread:$0]  %s1938_s2, 3712, %s35_s25, [#allocation7], %s1346_s1, %s1346_s1, %s1347_s16  }
  0x2a   :  { %1337 = dma.done.wait [#allocation4], 16  }
  0x2b   :  { %1338 = vsyncadd [#allocation4], 4294967280 }
  0x2c   :  { %1339 = dma.done.wait [#allocation3], 256  }
  0x2d   :  { %1340 = vsyncadd [#allocation3], 4294967040 }
  0x2e   :  { %1341 = dma.done.wait [#allocation7], 3712  }
  0x2f   :  { %1342 = vsyncadd [#allocation7], 4294963584 }
  0x30   :  { %50 = sfence }
  0x31   :  { %v1409_v0 = vld [vmem:[#allocation6] sm:$0xff]  ;;  %v1411_v1 = vld [vmem:[#allocation6 + $0x8] sm:$0xff]  ;;  %v1413_v2 = vld [vmem:[#allocation6 + $0x10] sm:$0xff]  ;;  %v1941_v3 = vmov 0.0|0.0   ;;  %vm82_vm0 = vcmask 793600   ;;  %vm86_vm1 = vcmask 1040384  }
  0x32   :  { %1006 = vmatprep.subr.bf16.mxu1 %v1941_v3  ;;  %1132 = vmatprep.subr.bf16.mxu0 %v1941_v3  ;;  %v91_v4 = vand.u32 4294901760, %v1409_v0  ;;  %v94_v5 = vand.u32 4294901760, %v1411_v1  ;;  %v1419_v6 = vld [vmem:[#allocation6 + $0x18] sm:$0xff]  ;;  %v97_v7 = vand.u32 4294901760, %v1413_v2  ;;  %v1423_v9 = vld [vmem:[#allocation6 + $0x20] sm:$0xff]  ;;  %v1425_v10 = vld [vmem:[#allocation6 + $0x28] sm:$0xff] }
  0x33   :  { %v100_v8 = vand.u32 4294901760, %v1419_v6  ;;  %v103_v13 = vand.u32 4294901760, %v1423_v9  ;;  %v106_v14 = vand.u32 4294901760, %v1425_v10  ;;  %v1445_v15 = vld [vmem:[#allocation6 + $0x30] sm:$0xff]  ;;  %v1447_v16 = vld [vmem:[#allocation6 + $0x38] sm:$0xff]  ;;  %v1461_v20 = vld [vmem:[#allocation6 + $0x40] sm:$0xff] }
  0x34   :  { %v1431_v11 = vpack.c.bf16 %v94_v5, %v91_v4  ;;  %v109_v18 = vand.u32 4294901760, %v1445_v15  ;;  %v112_v19 = vand.u32 4294901760, %v1447_v16  ;;  %v1463_v21 = vld [vmem:[#allocation6 + $0x48] sm:$0xff]  ;;  %v115_v23 = vand.u32 4294901760, %v1461_v20  ;;  %v1477_v25 = vld [vmem:[#allocation6 + $0x50] sm:$0xff]  ;;  %v1479_v26 = vld [vmem:[#allocation6 + $0x58] sm:$0xff] }
  0x35   :  { %v1439_v12 = vpack.c.bf16 %v100_v8, %v97_v7  ;;  %v1455_v17 = vpack.c.bf16 %v106_v14, %v103_v13  ;;  %v118_v24 = vand.u32 4294901760, %v1463_v21  ;;  %v52_v27 = vld [vmem:[#allocation5 + $0x8] sm:$0xff]  ;;  %v121_v29 = vand.u32 4294901760, %v1477_v25  ;;  %v1493_v31 = vld [vmem:[#allocation6 + $0x60] sm:$0xff]  ;;  %v1495_v32 = vld [vmem:[#allocation6 + $0x68] sm:$0xff]  ;;  %s913_s2 = sld [smem:[#allocation2]] }
  0x36   :  { %1008 = vmatpush1.bf16.msra.mxu1 %v1431_v11  ;;  %1134 = vmatpush1.bf16.msra.mxu0 %v1431_v11  ;;  %v1471_v22 = vpack.c.bf16 %v112_v19, %v109_v18  ;;  %v124_v30 = vand.u32 4294901760, %v1479_v26  ;;  %v84_v33 = vsel %vm82_vm0, %v52_v27, 0  ;;  %v127_v36 = vand.u32 4294901760, %v1493_v31  ;;  %v1511_v38 = vld [vmem:[#allocation6 + $0x70] sm:$0xff]  ;;  %v1513_v39 = vld [vmem:[#allocation6 + $0x78] sm:$0xff]  ;;  %v1531_v45 = vld [vmem:[#allocation6 + $0x80] sm:$0xff] }
  0x37   :  { %1009 = vmatprep.subr.bf16.mxu1 %v1941_v3  ;;  %1135 = vmatprep.subr.bf16.mxu0 %v1941_v3  ;;  %v1487_v28 = vpack.c.bf16 %v118_v24, %v115_v23  ;;  %v1497_v34 = vand.u32 4294901760, %v84_v33  ;;  %v130_v37 = vand.u32 4294901760, %v1495_v32  ;;  %v133_v43 = vand.u32 4294901760, %v1511_v38  ;;  %v1533_v46 = vld [vmem:[#allocation6 + $0x88] sm:$0xff]  ;;  %v71_v52 = vld [vmem:[#allocation6 + $0x90] sm:$0xff]  ;;  %v72_v53 = vld [vmem:[#allocation6 + $0x98] sm:$0xff] }
  0x38   :  { %v1505_v35 = vpack.c.bf16 %v124_v30, %v121_v29  ;;  %v136_v44 = vand.u32 4294901760, %v1513_v39  ;;  %v139_v50 = vand.u32 4294901760, %v1531_v45  ;;  %v142_v51 = vand.u32 4294901760, %v1533_v46  ;;  %v73_v57 = vld [vmem:[#allocation6 + $0xa0] sm:$0xff]  ;;  %v74_v58 = vld [vmem:[#allocation6 + $0xa8] sm:$0xff]  ;;  %v75_v62 = vld [vmem:[#allocation6 + $0xb0] sm:$0xff] }
  0x39   :  { %v1516_v40 = vsub.f32 %v84_v33, %v1497_v34  ;;  %v1525_v42 = vpack.c.bf16 %v130_v37, %v127_v36  ;;  %v145_v55 = vand.u32 4294901760, %v71_v52  ;;  %v148_v56 = vand.u32 4294901760, %v72_v53  ;;  %v76_v63 = vld [vmem:[#allocation6 + $0xb8] sm:$0xff]  ;;  %s997_s19 = sld [smem:[#allocation2 + $0x1]]  ;;  %s1350_s20 = smov 2  }
  0x3a   :  { %1011 = vmatpush1.bf16.msra.mxu1 %v1439_v12  ;;  %1137 = vmatpush1.bf16.msra.mxu0 %v1439_v12  ;;  %v1542_v49 = vpack.c.bf16 %v136_v44, %v133_v43  ;;  %v1550_v54 = vpack.c.bf16 %v142_v51, %v139_v50  ;;  %v151_v60 = vand.u32 4294901760, %v73_v57  ;;  %v154_v61 = vand.u32 4294901760, %v74_v58  ;;  %s1351_s21 = smov 1   ;;  %s1003_s24 = sld [smem:[#allocation2 + $0x5]] }
  0x3b   :  { %1012 = vmatprep.subr.bf16.mxu1 %v1941_v3  ;;  %1138 = vmatprep.subr.bf16.mxu0 %v1941_v3  ;;  %v185_v41 = vand.u32 4294901760, %v1516_v40  ;;  %v1556_v59 = vpack.c.bf16 %v148_v56, %v145_v55  ;;  %v1563_v27 = vsub.f32 %v1409_v0, %v91_v4  ;;  %v1568_v33 = vsub.f32 %v1411_v1, %v94_v5  ;;  %v51_v5 = vld [vmem:[#allocation5] sm:$0xff]  ;;  %s1001_s25 = sld [smem:[#allocation2 + $0x3]]  ;;  %s1352_s26 = smov 127  }
  0x3c   :  { %1952 = vst [vmem:[#allocation11_spill] sm:$0xff] %v1542_v49  ;;  %1953 = vst [vmem:[#allocation12_spill] sm:$0xff] %v1550_v54  ;;  %v1583_v0 = vsub.f32 %v1423_v9, %v103_v13  ;;  %v1588_v1 = vsub.f32 %v1425_v10, %v106_v14  ;;  %v1598_v4 = vsub.f32 %v1447_v16, %v112_v19  ;;  %v160_v9 = vand.u32 4294901760, %v76_v63  ;;  %v77_v10 = vld [vmem:[#allocation6 + $0xc0] sm:$0xff]  ;;  %v78_v13 = vld [vmem:[#allocation6 + $0xc8] sm:$0xff]  ;;  %s1002_s27 = sld [smem:[#allocation2 + $0x4]] }
  0x3d   :  { %v186_v47 = vsub.f32 %v1516_v40, %v185_v41  ;;  %644 = vmatprep.mubr.f32.mxu0 %v185_v41  ;;  %1954 = vst [vmem:[#allocation13_spill] sm:$0xff] %v1556_v59  ;;  %v1573_v41 = vsub.f32 %v1413_v2, %v97_v7  ;;  %v1593_v2 = vsub.f32 %v1445_v15, %v109_v18  ;;  %v79_v18 = vld [vmem:[#allocation6 + $0xd0] sm:$0xff]  ;;  %v80_v19 = vld [vmem:[#allocation6 + $0xd8] sm:$0xff]  ;;  %vm980_vm3 = vcmask 7168   ;;  %s1005_s28 = sld [smem:[#allocation2 + $0x7]]  ;;  %s1000_s29 = sld [smem:[#allocation2 + $0x2]] }
  0x3e   :  { %1014 = vmatpush1.bf16.msra.mxu1 %v1455_v17  ;;  %1140 = vmatpush1.bf16.msra.mxu0 %v1455_v17  ;;  %v1607_v7 = vpack.c.bf16 %v154_v61, %v151_v60  ;;  %v1612_v14 = vsub.f32 %v1463_v21, %v118_v24  ;;  %v1617_v15 = vsub.f32 %v1477_v25, %v121_v29  ;;  %v1641_v24 = vand.u32 4294901760, %v51_v5  ;;  %s1004_s30 = sld [smem:[#allocation2 + $0x6]] }
  0x3f   :  { %1015 = vmatprep.subr.bf16.mxu1 %v1941_v3  ;;  %1141 = vmatprep.subr.bf16.mxu0 %v1941_v3  ;;  %v187_v48 = vand.u32 4294901760, %v186_v47  ;;  %v1578_v47 = vsub.f32 %v1419_v6, %v100_v8  ;;  %v1603_v6 = vsub.f32 %v1461_v20, %v115_v23  ;;  %v157_v8 = vand.u32 4294901760, %v75_v62 }
  0x40   :  { %1955 = vst [vmem:[#allocation14_spill] sm:$0xff] %v1607_v7  ;;  %v1622_v16 = vsub.f32 %v1479_v26, %v124_v30  ;;  %v1629_v20 = vsub.f32 %v1493_v31, %v127_v36  ;;  %v1634_v21 = vsub.f32 %v1495_v32, %v130_v37  ;;  %v1639_v23 = vsub.f32 %v1511_v38, %v133_v43 }
  0x41   :  { %188 = vmatprep.mubr.f32.mxu1 %v187_v48  ;;  %v1646_v25 = vsub.f32 %v1513_v39, %v136_v44  ;;  %v1649_v26 = vsub.f32 %v1531_v45, %v139_v50  ;;  %v163_v29 = vand.u32 4294901760, %v77_v10  ;;  %v166_v30 = vand.u32 4294901760, %v78_v13  ;;  %v81_v50 = vld [vmem:[#allocation6 + $0xe0] sm:$0x1] }
  0x42   :  { %1017 = vmatpush1.bf16.msra.mxu1 %v1471_v22  ;;  %1143 = vmatpush1.bf16.msra.mxu0 %v1471_v22  ;;  %v1652_v31 = vsub.f32 %v1533_v46, %v142_v51  ;;  %v1656_v32 = vpack.c.bf16 %v160_v9, %v157_v8  ;;  %v169_v36 = vand.u32 4294901760, %v79_v18  ;;  %v172_v37 = vand.u32 4294901760, %v80_v19 }
  0x43   :  { %1018 = vmatprep.subr.bf16.mxu1 %v1941_v3  ;;  %1144 = vmatprep.subr.bf16.mxu0 %v1941_v3  ;;  %v1658_v38 = vsub.f32 %v71_v52, %v145_v55  ;;  %v1660_v39 = vsub.f32 %v72_v53, %v148_v56  ;;  %v1662_v43 = vsub.f32 %v73_v57, %v151_v60  ;;  %v202_v44 = vand.u32 4294901760, %v1563_v27 }
  0x44   :  { %1956 = vst [vmem:[#allocation15_spill] sm:$0xff] %v1656_v32  ;;  %v1667_v45 = vsub.f32 %v74_v58, %v154_v61  ;;  %v1669_v46 = vsub.f32 %v75_v62, %v157_v8  ;;  %v1671_v48 = vsub.f32 %v76_v63, %v160_v9  ;;  %v1674_v51 = vsub.f32 %v51_v5, %v1641_v24 }
  0x45   :  { %v1676_v52 = vpack.c.bf16 %v166_v30, %v163_v29  ;;  %v1678_v53 = vsub.f32 %v77_v10, %v163_v29  ;;  %v209_v55 = vand.u32 4294901760, %v1568_v33  ;;  %v216_v56 = vand.u32 4294901760, %v1573_v41 }
  0x46   :  { %1020 = vmatpush1.bf16.msra.mxu1 %v1487_v28  ;;  %1146 = vmatpush1.bf16.msra.mxu0 %v1487_v28  ;;  %1957 = vst [vmem:[#allocation16_spill] sm:$0xff] %v1674_v51  ;;  %v1684_v57 = vsub.f32 %v78_v13, %v166_v30  ;;  %v1686_v58 = vpack.c.bf16 %v172_v37, %v169_v36  ;;  %v223_v61 = vand.u32 4294901760, %v1578_v47  ;;  %v1696_v63 = vsel %vm86_vm1, %v81_v50, 0 }
  0x47   :  { %1021 = vmatprep.subr.bf16.mxu1 %v1941_v3  ;;  %1147 = vmatprep.subr.bf16.mxu0 %v1941_v3  ;;  %1958 = vst [vmem:[#allocation17_spill] sm:$0xff] %v1676_v52  ;;  %v1688_v60 = vsub.f32 %v79_v18, %v169_v36  ;;  %v1693_v62 = vsub.f32 %v80_v19, %v172_v37  ;;  %v191_v9 = vand.u32 4294901760, %v1674_v51  ;;  %v230_v50 = vand.u32 4294901760, %v1583_v0 }
  0x48   :  { %1959 = vst [vmem:[#allocation18_spill] sm:$0xff] %v1686_v58  ;;  %v203_v5 = vsub.f32 %v1563_v27, %v202_v44  ;;  %v210_v19 = vsub.f32 %v1568_v33, %v209_v55  ;;  %v217_v29 = vsub.f32 %v1573_v41, %v216_v56  ;;  %v224_v37 = vsub.f32 %v1578_v47, %v223_v61 }
  0x49   :  { %v237_v36 = vand.u32 4294901760, %v1588_v1  ;;  %v192_v18 = vsub.f32 %v1674_v51, %v191_v9  ;;  %v1741_v10 = vand.u32 4294901760, %v1696_v63  ;;  %v1949_v8 = vmov 0.0  }
  0x4a   :  { %1023 = vmatpush1.bf16.msra.mxu1 %v1505_v35  ;;  %1149 = vmatpush1.bf16.msra.mxu0 %v1505_v35  ;;  %v218_v13 = vand.u32 4294901760, %v217_v29  ;;  %v231_v51 = vsub.f32 %v1583_v0, %v230_v50  ;;  %v1178_v29 = vpack.c.bf16 %v223_v61, %v216_v56  ;;  %v279_v56 = vand.u32 4294901760, %v1622_v16 }
  0x4b   :  { %1024 = vmatprep.subr.bf16.mxu1 %v1941_v3  ;;  %1150 = vmatprep.subr.bf16.mxu0 %v1941_v3  ;;  %v193_v30 = vand.u32 4294901760, %v192_v18  ;;  %vm982_vm4 = vcmask 15368   ;;  %vm988_vm5 = vcmask 23568  }
  0x4e   :  { %1026 = vmatpush1.bf16.msra.mxu1 %v1525_v42  ;;  %1152 = vmatpush1.bf16.msra.mxu0 %v1525_v42 }
  0x4f   :  { %1027 = vmatprep.subr.bf16.mxu1 %v1941_v3  ;;  %1153 = vmatprep.subr.bf16.mxu0 %v1941_v3 }
  0x52   :  { %1029 = vmatpush1.bf16.msra.mxu1 %v1542_v49  ;;  %1155 = vmatpush1.bf16.msra.mxu0 %v1542_v49 }
  0x53   :  { %1030 = vmatprep.subr.bf16.mxu1 %v1941_v3  ;;  %1156 = vmatprep.subr.bf16.mxu0 %v1941_v3 }
  0x56   :  { %1032 = vmatpush1.bf16.msra.mxu1 %v1550_v54  ;;  %1158 = vmatpush1.bf16.msra.mxu0 %v1550_v54  ;;  %v1960_v54 = vmov 0.0|0.0  }
  0x57   :  { %1033 = vmatprep.subr.bf16.mxu1 %v1941_v3  ;;  %1159 = vmatprep.subr.bf16.mxu0 %v1941_v3 }
  0x5a   :  { %1035 = vmatpush1.bf16.msra.mxu1 %v1556_v59  ;;  %1161 = vmatpush1.bf16.msra.mxu0 %v1556_v59  ;;  %v244_v59 = vand.u32 4294901760, %v1593_v2 }
  0x5b   :  { %1036 = vmatprep.subr.bf16.mxu1 %v1941_v3  ;;  %1162 = vmatprep.subr.bf16.mxu0 %v1941_v3 }
  0x5e   :  { %1038 = vmatpush1.bf16.msra.mxu1 %v1607_v7  ;;  %1164 = vmatpush1.bf16.msra.mxu0 %v1607_v7  ;;  %v211_v7 = vand.u32 4294901760, %v210_v19 }
  0x5f   :  { %1039 = vmatprep.subr.bf16.mxu1 %v1941_v3  ;;  %1165 = vmatprep.subr.bf16.mxu0 %v1941_v3 }
  0x62   :  { %1041 = vmatpush1.bf16.msra.mxu1 %v1656_v32  ;;  %1167 = vmatpush1.bf16.msra.mxu0 %v1656_v32  ;;  %v204_v32 = vand.u32 4294901760, %v203_v5  ;;  %v238_v5 = vsub.f32 %v1588_v1, %v237_v36 }
  0x63   :  { %1042 = vmatprep.subr.bf16.mxu1 %v1941_v3  ;;  %1168 = vmatprep.subr.bf16.mxu0 %v1941_v3 }
  0x64   :  { %v1049_v19 = vpack.c.bf16 %v211_v7, %v204_v32  ;;  %v245_v7 = vsub.f32 %v1593_v2, %v244_v59 }
  0x66   :  { %1044 = vmatpush1.bf16.msra.mxu1 %v1676_v52  ;;  %1170 = vmatpush1.bf16.msra.mxu0 %v1676_v52  ;;  %v225_v52 = vand.u32 4294901760, %v224_v37  ;;  %v232_v37 = vand.u32 4294901760, %v231_v51  ;;  %v246_v61 = vand.u32 4294901760, %v245_v7 }
  0x67   :  { %1045 = vmatprep.subr.bf16.mxu1 %v1941_v3  ;;  %1171 = vmatprep.subr.bf16.mxu0 %v1941_v3  ;;  %v1175_v3 = vpack.c.bf16 %v209_v55, %v202_v44  ;;  %v258_v44 = vand.u32 4294901760, %v1603_v6  ;;  %v265_v55 = vand.u32 4294901760, %v1612_v14 }
  0x68   :  { %v1052_v18 = vpack.c.bf16 %v225_v52, %v218_v13  ;;  %v1181_v52 = vpack.c.bf16 %v237_v36, %v230_v50  ;;  %v280_v36 = vsub.f32 %v1622_v16, %v279_v56  ;;  %v286_v50 = vand.u32 4294901760, %v1629_v20 }
  0x69   :  { %v259_v13 = vsub.f32 %v1603_v6, %v258_v44  ;;  %v1187_v7 = vpack.c.bf16 %v265_v55, %v258_v44 }
  0x6a   :  { %1047 = vmatpush1.bf16.msra.mxu1 %v1686_v58  ;;  %1173 = vmatpush1.bf16.msra.mxu0 %v1686_v58  ;;  %v251_v58 = vand.u32 4294901760, %v1598_v4 }
  0x6b   :  { %174 = vmatprep.subr.mxu1 %v1949_v8  ;;  %632 = vmatprep.subr.mxu0 %v1949_v8  ;;  %v239_v8 = vand.u32 4294901760, %v238_v5 }
  0x6c   :  { %v252_v32 = vsub.f32 %v1598_v4, %v251_v58  ;;  %v1184_v5 = vpack.c.bf16 %v251_v58, %v244_v59  ;;  %v287_v59 = vsub.f32 %v1629_v20, %v286_v50  ;;  %v300_v58 = vand.u32 4294901760, %v1639_v23 }
  0x6d   :  { %v1055_v51 = vpack.c.bf16 %v239_v8, %v232_v37  ;;  %v293_v37 = vand.u32 4294901760, %v1634_v21 }
  0x6e   :  { %176 = vmatpush1.msra.mxu1 %v1741_v10  ;;  %634 = vmatpush1.msra.mxu0 %v1741_v10  ;;  %v301_v44 = vsub.f32 %v1639_v23, %v300_v58 }
  0x6f   :  { %1048 = vmatprep.subr.bf16.mxu1 %v1960_v54  ;;  %1174 = vmatprep.subr.bf16.mxu0 %v1960_v54 }
  0x70   :  { %194 = vmatmul.mubr.f32.vlgmr.msra.gmra.mrb[0].mxu1 %v193_v30  ;;  %648 = vmatmul.mubr.f32.vlgmr.msra.gmra.mrb[0].mxu0 %v191_v9  ;;  %v253_v9 = vand.u32 4294901760, %v252_v32  ;;  %v266_v30 = vsub.f32 %v1612_v14, %v265_v55  ;;  %v307_v32 = vand.u32 4294901760, %v1646_v25 }
  0x71   :  { %1050 = vmatpush1.bf16.msra.mxu1 %v1049_v19  ;;  %1176 = vmatpush1.bf16.msra.mxu0 %v1175_v3  ;;  %v272_v3 = vand.u32 4294901760, %v1617_v15 }
  0x72   :  { %1051 = vmatprep.subr.bf16.mxu1 %v1960_v54  ;;  %1177 = vmatprep.subr.bf16.mxu0 %v1960_v54  ;;  %v1058_v19 = vpack.c.bf16 %v253_v9, %v246_v61  ;;  %v281_v61 = vand.u32 4294901760, %v280_v36  ;;  %v294_v9 = vsub.f32 %v1634_v21, %v293_v37  ;;  %v308_v55 = vsub.f32 %v1646_v25, %v307_v32 }
  0x73   :  { %409 = vmatprep.mubr.f32.mxu1 %v1497_v34  ;;  %805 = vmatprep.mubr.f32.mxu0 %v1497_v34  ;;  %v273_v8 = vsub.f32 %v1617_v15, %v272_v3  ;;  %v1193_v36 = vpack.c.bf16 %v293_v37, %v286_v50 }
  0x75   :  { %1053 = vmatpush1.bf16.msra.mxu1 %v1052_v18  ;;  %1179 = vmatpush1.bf16.msra.mxu0 %v1178_v29  ;;  %v260_v18 = vand.u32 4294901760, %v259_v13  ;;  %v267_v29 = vand.u32 4294901760, %v266_v30  ;;  %v1190_v13 = vpack.c.bf16 %v279_v56, %v272_v3  ;;  %v288_v30 = vand.u32 4294901760, %v287_v59 }
  0x76   :  { %1054 = vmatprep.subr.bf16.mxu1 %v1960_v54  ;;  %1180 = vmatprep.subr.bf16.mxu0 %v1960_v54  ;;  %v309_v3 = vand.u32 4294901760, %v308_v55  ;;  %v328_v56 = vand.u32 4294901760, %v1658_v38 }
  0x78   :  { %v329_v50 = vsub.f32 %v1658_v38, %v328_v56 }
  0x79   :  { %1056 = vmatpush1.bf16.msra.mxu1 %v1055_v51  ;;  %1182 = vmatpush1.bf16.msra.mxu0 %v1181_v52  ;;  %v1061_v51 = vpack.c.bf16 %v267_v29, %v260_v18  ;;  %v274_v52 = vand.u32 4294901760, %v273_v8  ;;  %v321_v8 = vand.u32 4294901760, %v1652_v31  ;;  %v302_v18 = vand.u32 4294901760, %v301_v44 }
  0x7a   :  { %1057 = vmatprep.subr.bf16.mxu1 %v1960_v54  ;;  %1183 = vmatprep.subr.bf16.mxu0 %v1960_v54  ;;  %v335_v29 = vand.u32 4294901760, %v1660_v39  ;;  %v330_v55 = vand.u32 4294901760, %v329_v50  ;;  %v377_v50 = vand.u32 4294901760, %v1684_v57 }
  0x7b   :  { %v1064_v49 = vpack.c.bf16 %v281_v61, %v274_v52  ;;  %v1070_v52 = vpack.c.bf16 %v309_v3, %v302_v18  ;;  %v1196_v61 = vpack.c.bf16 %v307_v32, %v300_v58  ;;  %v356_v58 = vand.u32 4294901760, %v1669_v46 }
  0x7c   :  { %v336_v37 = vsub.f32 %v1660_v39, %v335_v29  ;;  %v363_v3 = vand.u32 4294901760, %v1671_v48 }
  0x7d   :  { %1059 = vmatpush1.bf16.msra.mxu1 %v1058_v19  ;;  %1185 = vmatpush1.bf16.msra.mxu0 %v1184_v5  ;;  %v295_v19 = vand.u32 4294901760, %v294_v9  ;;  %v314_v5 = vand.u32 4294901760, %v1649_v26 }
  0x7e   :  { %1060 = vmatprep.subr.bf16.mxu1 %v1960_v54  ;;  %1186 = vmatprep.subr.bf16.mxu0 %v1960_v54 }
  0x7f   :  { %v315_v59 = vsub.f32 %v1649_v26, %v314_v5  ;;  %v1199_v44 = vpack.c.bf16 %v321_v8, %v314_v5  ;;  %v357_v5 = vsub.f32 %v1669_v46, %v356_v58 }
  0x81   :  { %1062 = vmatpush1.bf16.msra.mxu1 %v1061_v51  ;;  %1188 = vmatpush1.bf16.msra.mxu0 %v1187_v7  ;;  %v1067_v7 = vpack.c.bf16 %v295_v19, %v288_v30  ;;  %v322_v51 = vsub.f32 %v1652_v31, %v321_v8  ;;  %v316_v9 = vand.u32 4294901760, %v315_v59  ;;  %v349_v30 = vand.u32 4294901760, %v1667_v45 }
  0x82   :  { %1063 = vmatprep.subr.bf16.mxu1 %v1960_v54  ;;  %1189 = vmatprep.subr.bf16.mxu0 %v1960_v54  ;;  %v337_v19 = vand.u32 4294901760, %v336_v37  ;;  %v1202_v59 = vpack.c.bf16 %v335_v29, %v328_v56  ;;  %v370_v8 = vand.u32 4294901760, %v1678_v53  ;;  %v384_v29 = vand.u32 4294901760, %v1688_v60 }
  0x83   :  { %v350_v18 = vsub.f32 %v1667_v45, %v349_v30 }
  0x84   :  { %v371_v56 = vsub.f32 %v1678_v53, %v370_v8 }
  0x85   :  { %1065 = vmatpush1.bf16.msra.mxu1 %v1064_v49  ;;  %1191 = vmatpush1.bf16.msra.mxu0 %v1190_v13  ;;  %v323_v49 = vand.u32 4294901760, %v322_v51  ;;  %v342_v13 = vand.u32 4294901760, %v1662_v43 }
  0x86   :  { %1066 = vmatprep.subr.bf16.mxu1 %v1960_v54  ;;  %1192 = vmatprep.subr.bf16.mxu0 %v1960_v54 }
  0x87   :  { %v1073_v32 = vpack.c.bf16 %v323_v49, %v316_v9  ;;  %v1205_v37 = vpack.c.bf16 %v349_v30, %v342_v13  ;;  %v358_v9 = vand.u32 4294901760, %v357_v5  ;;  %v1208_v30 = vpack.c.bf16 %v363_v3, %v356_v58 }
  0x89   :  { %1068 = vmatpush1.bf16.msra.mxu1 %v1067_v7  ;;  %1194 = vmatpush1.bf16.msra.mxu0 %v1193_v36  ;;  %v343_v36 = vsub.f32 %v1662_v43, %v342_v13  ;;  %v1076_v7 = vpack.c.bf16 %v337_v19, %v330_v55  ;;  %v378_v55 = vsub.f32 %v1684_v57, %v377_v50  ;;  %v391_v19 = vand.u32 4294901760, %v1693_v62 }
  0x8a   :  { %1069 = vmatprep.subr.bf16.mxu1 %v1960_v54  ;;  %1195 = vmatprep.subr.bf16.mxu0 %v1960_v54  ;;  %v1817_v13 = vsub.f32 %v1696_v63, %v1741_v10 }
  0x8b   :  { %v344_v51 = vand.u32 4294901760, %v343_v36 }
  0x8c   :  { %v398_v5 = vand.u32 4294901760, %v1817_v13 }
  0x8d   :  { %1071 = vmatpush1.bf16.msra.mxu1 %v1070_v52  ;;  %1197 = vmatpush1.bf16.msra.mxu0 %v1196_v61  ;;  %v351_v52 = vand.u32 4294901760, %v350_v18  ;;  %v364_v61 = vsub.f32 %v1671_v48, %v363_v3  ;;  %v379_v18 = vand.u32 4294901760, %v378_v55 }
  0x8e   :  { %1072 = vmatprep.subr.bf16.mxu1 %v1960_v54  ;;  %1198 = vmatprep.subr.bf16.mxu0 %v1960_v54 }
  0x8f   :  { %v1079_v49 = vpack.c.bf16 %v351_v52, %v344_v51  ;;  %v1211_v51 = vpack.c.bf16 %v377_v50, %v370_v8  ;;  %v1961_v8 = vmov 0.0   ;;  %v1962_v50 = vpack.c.bf16 %v1568_v33, %v1563_v27  ;;  %v1972_v27 = vld [vmem:[#allocation12_spill] sm:$0xff]  ;;  %v1974_v33 = vld [vmem:[#allocation13_spill] sm:$0xff] }
  0x91   :  { %1074 = vmatpush1.bf16.msra.mxu1 %v1073_v32  ;;  %1200 = vmatpush1.bf16.msra.mxu0 %v1199_v44  ;;  %v365_v44 = vand.u32 4294901760, %v364_v61  ;;  %v372_v32 = vand.u32 4294901760, %v371_v56  ;;  %v1214_v61 = vpack.c.bf16 %v391_v19, %v384_v29  ;;  %v1963_v56 = vpack.c.bf16 %v1578_v47, %v1573_v41  ;;  %v1976_v47 = vld [vmem:[#allocation14_spill] sm:$0xff] }
  0x92   :  { %1075 = vmatprep.subr.bf16.mxu1 %v1960_v54  ;;  %1201 = vmatprep.subr.bf16.mxu0 %v1960_v54  ;;  %v1975_v41 = vpack.c.bf16 %v1667_v45, %v1662_v43 }
  0x93   :  { %v1082_v36 = vpack.c.bf16 %v365_v44, %v358_v9  ;;  %v1085_v63 = vpack.c.bf16 %v379_v18, %v372_v32 }
  0x95   :  { %1077 = vmatpush1.bf16.msra.mxu1 %v1076_v7  ;;  %1203 = vmatpush1.bf16.msra.mxu0 %v1202_v59  ;;  %v385_v7 = vsub.f32 %v1688_v60, %v384_v29  ;;  %v392_v59 = vsub.f32 %v1693_v62, %v391_v19 }
  0x96   :  { %1078 = vmatprep.subr.bf16.mxu1 %v1960_v54  ;;  %1204 = vmatprep.subr.bf16.mxu0 %v1960_v54 }
  0x97   :  { %v386_v58 = vand.u32 4294901760, %v385_v7  ;;  %v393_v3 = vand.u32 4294901760, %v392_v59  ;;  %v945_v59 = vstv %s1001_s25 }
  0x99   :  { %1080 = vmatpush1.bf16.msra.mxu1 %v1079_v49  ;;  %1206 = vmatpush1.bf16.msra.mxu0 %v1205_v37  ;;  %v1088_v52 = vpack.c.bf16 %v393_v3, %v386_v58  ;;  %v399_v37 = vsub.f32 %v1817_v13, %v398_v5 }
  0x9a   :  { %1081 = vmatprep.subr.bf16.mxu1 %v1960_v54  ;;  %1207 = vmatprep.subr.bf16.mxu0 %v1960_v54 }
  0x9b   :  { %v400_v9 = vand.u32 4294901760, %v399_v37 }
  0x9d   :  { %1083 = vmatpush1.bf16.msra.mxu1 %v1082_v36  ;;  %1209 = vmatpush1.bf16.msra.mxu0 %v1208_v30  ;;  %v956_v36 = vstv %s1003_s24 }
  0x9e   :  { %1084 = vmatprep.subr.bf16.mxu1 %v1960_v54  ;;  %1210 = vmatprep.subr.bf16.mxu0 %v1960_v54 }
  0xa1   :  { %1086 = vmatpush1.bf16.msra.mxu1 %v1085_v63  ;;  %1212 = vmatpush1.bf16.msra.mxu0 %v1211_v51 }
  0xa2   :  { %1087 = vmatprep.subr.bf16.mxu1 %v1960_v54  ;;  %1213 = vmatprep.subr.bf16.mxu0 %v1960_v54 }
  0xa5   :  { %1089 = vmatpush1.bf16.msra.mxu1 %v1088_v52  ;;  %1215 = vmatpush1.bf16.msra.mxu0 %v1214_v61  ;;  %v954_v61 = vstv %s1002_s27 }
  0xa6   :  { %395 = vmatprep.subr.mxu1 %v1961_v8  ;;  %793 = vmatprep.subr.mxu0 %v1961_v8 }
  0xa9   :  { %401 = vmatpush1.msra.mxu1 %v400_v9  ;;  %797 = vmatpush1.msra.mxu0 %v398_v5  ;;  %v963_v9 = vstv %s1005_s28 }
  0xaa   :  { %1090 = vmatprep.subr.bf16.mxu1 %v1960_v54  ;;  %1216 = vmatprep.subr.bf16.mxu0 %v1960_v54 }
  0xab   :  { %411 = vmatmul.mubr.f32.vlgmr.msra.gmra.mrb[0].mxu1 %v1641_v24  ;;  %807 = vmatmul.mubr.f32.vlgmr.msra.gmra.mrb[0].mxu0 %v1641_v24 }
  0xac   :  { %1092 = vmatpush1.bf16.msra.mxu1 %v1962_v50  ;;  %1218 = vmatpush1.bf16.msra.mxu0 %v1431_v11  ;;  %v1964_v11 = vpack.c.bf16 %v1588_v1, %v1583_v0  ;;  %v1977_v0 = vpack.c.bf16 %v1671_v48, %v1669_v46  ;;  %v1978_v1 = vld [vmem:[#allocation15_spill] sm:$0xff]  ;;  %v943_v50 = vstv %s1000_s29 }
  0xad   :  { %1093 = vmatprep.subr.bf16.mxu1 %v1960_v54  ;;  %1219 = vmatprep.subr.bf16.mxu0 %v1960_v54 }
  0xae   :  { %540 = vmatprep.mubr.f32.mxu1 %v1516_v40  ;;  %906 = vmatprep.mubr.f32.mxu0 %v1497_v34  ;;  %v1965_v34 = vpack.c.bf16 %v1598_v4, %v1593_v2  ;;  %v1970_v40 = vld [vmem:[#allocation11_spill] sm:$0xff]  ;;  %v1979_v2 = vpack.c.bf16 %v1684_v57, %v1678_v53  ;;  %v1980_v4 = vld [vmem:[#allocation17_spill] sm:$0xff] }
  0xb0   :  { %1095 = vmatpush1.bf16.msra.mxu1 %v1963_v56  ;;  %1221 = vmatpush1.bf16.msra.mxu0 %v1439_v12  ;;  %v1966_v12 = vpack.c.bf16 %v1612_v14, %v1603_v6  ;;  %v1981_v6 = vpack.c.bf16 %v1693_v62, %v1688_v60  ;;  %v1982_v14 = vld [vmem:[#allocation18_spill] sm:$0xff] }
  0xb1   :  { %1096 = vmatprep.subr.bf16.mxu1 %v1960_v54  ;;  %1222 = vmatprep.subr.bf16.mxu0 %v1960_v54 }
  0xb4   :  { %1098 = vmatpush1.bf16.msra.mxu1 %v1964_v11  ;;  %1224 = vmatpush1.bf16.msra.mxu0 %v1455_v17  ;;  %v1967_v17 = vpack.c.bf16 %v1622_v16, %v1617_v15  ;;  %v1983_v15 = vld [vmem:[#allocation16_spill] sm:$0xff] }
  0xb5   :  { %1099 = vmatprep.subr.bf16.mxu1 %v1960_v54  ;;  %1225 = vmatprep.subr.bf16.mxu0 %v1960_v54 }
  0xb8   :  { %1101 = vmatpush1.bf16.msra.mxu1 %v1965_v34  ;;  %1227 = vmatpush1.bf16.msra.mxu0 %v1471_v22  ;;  %v1968_v22 = vpack.c.bf16 %v1634_v21, %v1629_v20  ;;  %v915_v20 = vstv %s913_s2 }
  0xb9   :  { %1102 = vmatprep.subr.bf16.mxu1 %v1960_v54  ;;  %1228 = vmatprep.subr.bf16.mxu0 %v1960_v54 }
  0xbc   :  { %1104 = vmatpush1.bf16.msra.mxu1 %v1966_v12  ;;  %1230 = vmatpush1.bf16.msra.mxu0 %v1487_v28  ;;  %v1969_v28 = vpack.c.bf16 %v1646_v25, %v1639_v23  ;;  %v952_v12 = vstv %s1004_s30 }
  0xbd   :  { %1105 = vmatprep.subr.bf16.mxu1 %v1960_v54  ;;  %1231 = vmatprep.subr.bf16.mxu0 %v1960_v54 }
  0xc0   :  { %1107 = vmatpush1.bf16.msra.mxu1 %v1967_v17  ;;  %1233 = vmatpush1.bf16.msra.mxu0 %v1505_v35  ;;  %v1971_v35 = vpack.c.bf16 %v1652_v31, %v1649_v26  ;;  %v917_v26 = vstv %s997_s19 }
  0xc1   :  { %1108 = vmatprep.subr.bf16.mxu1 %v1960_v54  ;;  %1234 = vmatprep.subr.bf16.mxu0 %v1960_v54 }
  0xc4   :  { %1110 = vmatpush1.bf16.msra.mxu1 %v1968_v22  ;;  %1236 = vmatpush1.bf16.msra.mxu0 %v1525_v42  ;;  %v1973_v42 = vpack.c.bf16 %v1660_v39, %v1658_v38 }
  0xc5   :  { %1111 = vmatprep.subr.bf16.mxu1 %v1960_v54  ;;  %1237 = vmatprep.subr.bf16.mxu0 %v1960_v54 }
  0xc8   :  { %1113 = vmatpush1.bf16.msra.mxu1 %v1969_v28  ;;  %1239 = vmatpush1.bf16.msra.mxu0 %v1970_v40 }
  0xc9   :  { %1114 = vmatprep.subr.bf16.mxu1 %v1960_v54  ;;  %1240 = vmatprep.subr.bf16.mxu0 %v1960_v54 }
  0xcc   :  { %1116 = vmatpush1.bf16.msra.mxu1 %v1971_v35  ;;  %1242 = vmatpush1.bf16.msra.mxu0 %v1972_v27 }
  0xcd   :  { %1117 = vmatprep.subr.bf16.mxu1 %v1960_v54  ;;  %1243 = vmatprep.subr.bf16.mxu0 %v1960_v54 }
  0xd0   :  { %1119 = vmatpush1.bf16.msra.mxu1 %v1973_v42  ;;  %1245 = vmatpush1.bf16.msra.mxu0 %v1974_v33 }
  0xd1   :  { %1120 = vmatprep.subr.bf16.mxu1 %v1960_v54  ;;  %1246 = vmatprep.subr.bf16.mxu0 %v1960_v54 }
  0xd4   :  { %1122 = vmatpush1.bf16.msra.mxu1 %v1975_v41  ;;  %1248 = vmatpush1.bf16.msra.mxu0 %v1976_v47 }
  0xd5   :  { %1123 = vmatprep.subr.bf16.mxu1 %v1960_v54  ;;  %1249 = vmatprep.subr.bf16.mxu0 %v1960_v54 }
  0xd8   :  { %1125 = vmatpush1.bf16.msra.mxu1 %v1977_v0  ;;  %1251 = vmatpush1.bf16.msra.mxu0 %v1978_v1 }
  0xd9   :  { %1126 = vmatprep.subr.bf16.mxu1 %v1960_v54  ;;  %1252 = vmatprep.subr.bf16.mxu0 %v1960_v54 }
  0xdc   :  { %1128 = vmatpush1.bf16.msra.mxu1 %v1979_v2  ;;  %1254 = vmatpush1.bf16.msra.mxu0 %v1980_v4 }
  0xdd   :  { %1129 = vmatprep.subr.bf16.mxu1 %v1960_v54  ;;  %1255 = vmatprep.subr.bf16.mxu0 %v1960_v54 }
  0xe0   :  { %1131 = vmatpush1.bf16.msra.mxu1 %v1981_v6  ;;  %1257 = vmatpush1.bf16.msra.mxu0 %v1982_v14 }
  0xe1   :  { %528 = vmatprep.subr.mxu1 %v1961_v8  ;;  %896 = vmatprep.subr.mxu0 %v1961_v8 }
  0xe4   :  { %531 = vmatpush1.msra.mxu1 %v1817_v13  ;;  %898 = vmatpush1.msra.mxu0 %v1741_v10 }
  0xe5   :  { %543 = vmatmul.mubr.f32.vlgmr.msra.gmra.mrb[0].mxu1 %v1983_v15  ;;  %908 = vmatmul.mubr.f32.vlgmr.msra.gmra.mrb[0].mxu0 %v1641_v24 }
 0x1b8   :  { %v544_v54 = vpop.f32.mrb[0].mxu1  ;;  %v909_v16 = vpop.f32.mrb[0].mxu0 }
 0x1b9   :  { %v1258_v21 = vadd.f32 %v909_v16, %v544_v54  ;;  %v546_v23 = vpop.f32.mrb[1].mxu1  ;;  %v911_v25 = vpop.f32.mrb[1].mxu0 }
 0x1bb   :  { %v916_v31 = vmul.f32 %v1258_v21, %v915_v20  ;;  %1277 = vrcp.f32 %v1258_v21 }
 0x1bd   :  { %v918_v38 = vadd.f32 %v917_v26, %v916_v31 }
 0x1bf   :  { %v966_v39 = vand.u32 2147483647, %v918_v38  ;;  %v965_v49 = vmax.f32 %v918_v38, 0.0 }
 0x1c1   :  { %v967_v43 = vsub.f32 0.0, %v966_v39 }
 0x1c3   :  { %v968_v45 = vmul.f32 1.442695, %v967_v43 }
 0x1c5   :  { %v1278_v46 = vpop.eup %1277  ;;  %1279 = vpow2.f32 %v968_v45 }
 0x1c6   :  { %927 = vrot.lane.b32.xlu0 %v1278_v46, %s1350_s20 }
 0x1ca   :  { %922 = vrot.lane.b32.xlu0 %v1278_v46, %s1351_s21 }
 0x1cf   :  { %v1280_v24 = vpop.eup %1279 }
 0x1d0   :  { %v970_v48 = vadd.f32 1.0, %v1280_v24  ;;  %v973_v53 = vmul.f32 -0.5, %v1280_v24  ;;  %v976_v60 = vand.u32 2147483647, %v1280_v24 }
 0x1d2   :  { %1281 = vlog2.f32 %v970_v48  ;;  %v974_v57 = vadd.f32 1.0, %v973_v53  ;;  %vm977_vm2 = vcmp.lt.f32.partialorder %v976_v60, 0.0004427343 }
 0x1d4   :  { %v975_v29 = vmul.f32 %v1280_v24, %v974_v57 }
 0x1dc   :  { %v1282_v62 = vpop.eup %1281 }
 0x1dd   :  { %v972_v10 = vmul.f32 0.6931472, %v1282_v62 }
 0x1df   :  { %v978_v44 = vsel %vm977_vm2, %v975_v29, %v972_v10 }
 0x1e0   :  { %v979_v55 = vadd.f32 %v978_v44, %v965_v49 }
 0x1e2   :  { %981 = vst.msk [vmem:[%s1939_s3] sm:$0xff] %vm980_vm3, %v979_v55 }
 0x238   :  { %v928_v19 = vpop.permute.xlu0 %927 }
 0x239   :  { %v930_v13 = vmul.f32 %v1258_v21, %v928_v19 }
 0x23b   :  { %v999_v30 = vadd.f32 -30.3, %v930_v13 }
 0x23c   :  { %v923_v63 = vpop.permute.xlu0 %922 }
 0x23d   :  { %v935_v32 = vadd.f32 2.02, %v999_v30  ;;  %v925_v51 = vmul.f32 %v1258_v21, %v923_v63 }
 0x23f   :  { %v936_v18 = vmul.f32 0.24752475, %v935_v32  ;;  %v998_v58 = vadd.f32 -30.3, %v925_v51 }
 0x241   :  { %v957_v7 = vmul.f32 %v956_v36, %v936_v18  ;;  %v946_v5 = vmul.f32 %v945_v59, %v936_v18  ;;  %v932_v3 = vadd.f32 2.02, %v998_v58 }
 0x243   :  { %959 = vrot.lane.b32.xlu1 %v957_v7, %s1352_s26  ;;  %v934_v52 = vmul.f32 0.24752475, %v932_v3 }
 0x245   :  { %v955_v37 = vmul.f32 %v954_v61, %v934_v52  ;;  %v944_v34 = vmul.f32 %v943_v50, %v934_v52 }
 0x247   :  { %948 = vrot.lane.b32.xlu1 %v946_v5, %s1352_s26 }
 0x2b5   :  { %v960_v8 = vpop.permute.xlu1 %959 }
 0x2b6   :  { %v962_v56 = vadd.f32 %v960_v8, %v955_v37 }
 0x2b8   :  { %v964_v11 = vadd.f32 %v963_v9, %v962_v56 }
 0x2b9   :  { %v949_v17 = vpop.permute.xlu1 %948 }
 0x2ba   :  { %v951_v22 = vadd.f32 %v949_v17, %v944_v34  ;;  %985 = vrot.lane.b32.xlu0 %v964_v11, %s1351_s21 }
 0x2bc   :  { %v953_v28 = vadd.f32 %v952_v12, %v951_v22 }
 0x2be   :  { %983 = vst.msk [vmem:[%s1939_s3] sm:$0xff] %vm982_vm4, %v953_v28 }
 0x32c   :  { %v986_v40 = vpop.permute.xlu0 %985 }
 0x32d   :  { %989 = vst.msk [vmem:[%s1939_s3] sm:$0xff] %vm988_vm5, %v986_v40 }
 0x32e   :  { %994 = vsyncpa [#allocation3], 1 }
 0x32f   :  { %995 = vsyncpa [#allocation7], 1 }
 0x330   :  { %996 = vsyncpa [#allocation4], 1 }

</bundles_post_ra>
